<compile_context>
chip_gen: v6e
topology: v6e:2x2x1
jax: 0.10.0
libtpu: 0.0.40
codegen_flags: <defaults>
</compile_context>

<pallas_src>
import jax
import jax.numpy as jnp
import numpy as np
from jax import lax
from jax.experimental import pallas as pl
from jax.experimental.pallas import tpu as pltpu


def _triloss_kernel(x_ref, lab_ref, out_ref, x1_ref):
    # x_ref:   (4B, D) f32 -- the whole `inputs` matrix, resident in VMEM.
    # lab_ref: (1, 2B) f32 -- labels of input1 = cat(vis, ntm) (row layout).
    # out_ref: (1, 1)  f32 -- loss1.
    # x1_ref:  (2B, D) f32 VMEM scratch holding input1.
    four_b, d_feat = x_ref.shape
    b = four_b // 4
    n = 2 * b

    # Gather input1 = [vis ; ntm] (rows 0:b and 3b:4b of `inputs`) into one
    # VMEM tile; replaces the previous jnp.concatenate temp on the critical
    # path.  Both copies are sublane-aligned static slices.
    x1_ref[0:b, :] = x_ref[0:b, :]
    x1_ref[b:n, :] = x_ref[3 * b:4 * b, :]
    x = x1_ref[...]                                                    # (n, D)

    # Exact squared row norms via a lane (VPU) reduction -- NOT the Gram
    # diagonal, which would leak matmul rounding into ||x_i||^2.
    row_sq = jnp.sum(x * x, axis=1, keepdims=True)                     # (n, 1)

    # Gram matrix at full f32 precision: the downstream sqrt of small
    # differences is sensitive to matmul error, so no bf16 shortcut here.
    # TODO(synk): benchmark lax.Precision.HIGH at production sizes and
    # re-validate (only pays off if the MXU, not the EUP sqrt chain, binds).
    g = lax.dot_general(x, x, (((1,), (1,)), ((), ())),
                        precision=lax.Precision.HIGHEST,
                        preferred_element_type=jnp.float32)            # (n, n)

    # d[i,j] = ||x_i||^2 + ||x_j||^2 - g[i,j] - g[j,i], assembled with one
    # (n, n) XLU transpose instead of the old ones-vector MXU matmul; d is
    # exactly symmetric by construction.
    half = row_sq - g                                                  # (n, n)
    d = half + jnp.transpose(half)

    # Self-distance is exactly 0; pin the diagonal so it carries no
    # catastrophic-cancellation noise (deterministic across backends).
    r = lax.broadcasted_iota(jnp.int32, (n, n), 0)
    c = lax.broadcasted_iota(jnp.int32, (n, n), 1)
    d = jnp.where(r == c, 0.0, d)

    dist_vm = jnp.sqrt(jnp.maximum(d, 1e-12))
    dist_nm = jnp.sqrt(dist_vm)        # dist_vm >= 1e-6, redundant clamp dropped

    # Same-identity mask from the single (1, n) label row; the column
    # orientation is produced in-kernel by an (n, n) XLU transpose (labels are
    # small integer ids, exact in f32).
    lab = jnp.broadcast_to(lab_ref[...], (n, n))
    mask = (lab == jnp.transpose(lab)).astype(jnp.float32)             # (n, n)
    cnt = jnp.sum(mask, axis=1, keepdims=True)                         # (n, 1)

    # Fused ap2/ap3 pipelines: |ap2 - ap3| = |mean_i mean_{j in mask_i}(vm - nm)|.
    # Exact division kept (cnt is a tiny exact integer; approx reciprocal
    # error would eat into the kernel-vs-reference tolerance for no gain).
    rows = jnp.sum((dist_vm - dist_nm) * mask, axis=1, keepdims=True) / cnt
    total = jnp.sum(rows, axis=0, keepdims=True)                       # (1, 1)
    out_ref[...] = jnp.abs(total) * (1.0 / n)


@jax.jit
def tri_loss(inputs, targets):
    """Pallas implementation of TriLoss.forward (returns the scalar loss1)."""
    four_b, d_feat = inputs.shape
    b = four_b // 4
    n = 2 * b
    inputs = inputs.astype(jnp.float32)
    # Single lane-dense (1, n) label row; the (n, 1) orientation is built
    # in-kernel, so only one label DMA is issued.
    lab_row = targets.astype(jnp.float32).reshape(1, n)

    # Single-shot, grid-less call: at this size everything fits one VMEM tile,
    # so inputs are mapped straight into VMEM with no pipelining / double
    # buffering and the body runs exactly once.
    # TODO(synk): for production n, switch to an (i, j) tile grid over the
    # (n, n) distance matrix (per-tile Gram + masked-diff row accumulators in
    # VMEM scratch; j axis "arbitrary" reduction last, i axis "parallel"),
    # with per-chip tile sizing (v7x: 64 MiB VMEM, 2 TCs; v6e: 256-multiple
    # tiles; v5e: 128-multiple tiles) and the feature axis padded to a
    # multiple of 128 before the Gram matmul.
    out = pl.pallas_call(
        _triloss_kernel,
        out_shape=jax.ShapeDtypeStruct((1, 1), jnp.float32),
        in_specs=[
            pl.BlockSpec(memory_space=pltpu.MemorySpace.VMEM),   # inputs (4B, D)
            pl.BlockSpec(memory_space=pltpu.MemorySpace.VMEM),   # labels (1, n)
        ],
        out_specs=pl.BlockSpec(memory_space=pltpu.MemorySpace.VMEM),
        scratch_shapes=[pltpu.VMEM((n, d_feat), jnp.float32)],   # input1 buffer
    )(inputs, lab_row)
    return out[0, 0]


def tri_loss_ref(inputs, targets):
    """Pure-JAX reference mirroring the PyTorch forward value."""
    four_b, _ = inputs.shape
    b = four_b // 4
    vis = inputs[0 * b:1 * b]
    ntm = inputs[3 * b:4 * b]
    x = jnp.concatenate([vis, ntm], axis=0).astype(jnp.float32)
    n = x.shape[0]
    sq = jnp.sum(x * x, axis=1, keepdims=True)
    g = jnp.dot(x, x.T, precision=lax.Precision.HIGHEST)
    d = sq + sq.T - 2.0 * g
    d = jnp.where(jnp.eye(n, dtype=bool), 0.0, d)       # self-distance == 0
    dist_vm = jnp.sqrt(jnp.clip(d, 1e-12, None))
    dist_nm = jnp.sqrt(dist_vm)
    mask = targets[:, None] == targets[None, :]
    cnt = jnp.sum(mask, axis=1)
    ap2 = jnp.mean(jnp.sum(jnp.where(mask, dist_vm, 0.0), axis=1) / cnt)
    ap3 = jnp.mean(jnp.sum(jnp.where(mask, dist_nm, 0.0), axis=1) / cnt)
    return jnp.abs(ap2 - ap3)


if __name__ == "__main__":
    key = jax.random.PRNGKey(0)
    B, D = 8, 64                     # inputs: (4*B, D) = (32, 64); n = 2*B = 16
    inputs = jax.random.normal(key, (4 * B, D), dtype=jnp.float32)
    # Deterministic labels: 2 rows per identity, shared between vis and ntm.
    labels_half = jnp.array([i // 2 for i in range(B)], dtype=jnp.int32)
    targets = jnp.concatenate([labels_half, labels_half])             # (2*B,)

    loss = jax.block_until_ready(tri_loss(inputs, targets))
    loss_ref = jax.block_until_ready(tri_loss_ref(inputs, targets))
    np.testing.assert_allclose(np.asarray(loss), np.asarray(loss_ref),
                               rtol=5e-5, atol=5e-5)
    print("KERNEL_OK")
</pallas_src>

<mosaic_0001>
module attributes {stable_mosaic.version = 11 : i64} {
  func.func @_triloss_kernel(%arg0: memref<32x64xf32, #tpu.memory_space<vmem>>, %arg1: memref<1x16xf32, #tpu.memory_space<vmem>>, %arg2: memref<1x1xf32, #tpu.memory_space<vmem>>, %arg3: memref<16x64xf32, #tpu.memory_space<vmem>>) attributes {dimension_semantics = [], scalar_prefetch = 0 : i64, scratch_operands = 1 : i64, tpu.core_type = #tpu.core_type<tc>} {
    %c0 = arith.constant 0 : index
    %c0_0 = arith.constant 0 : index
    %0 = vector.load %arg0[%c0, %c0_0] : memref<32x64xf32, #tpu.memory_space<vmem>>, vector<8x64xf32>
    %c0_1 = arith.constant 0 : index
    %c0_2 = arith.constant 0 : index
    %1 = vector.load %arg3[%c0_1, %c0_2] : memref<16x64xf32, #tpu.memory_space<vmem>>, vector<8x64xf32>
    tpu.vector_store %arg3[%c0_1, %c0_2], %0 {strides = array<i32>} : memref<16x64xf32, #tpu.memory_space<vmem>>, vector<8x64xf32>,
    %c24 = arith.constant 24 : index
    %c0_3 = arith.constant 0 : index
    %2 = vector.load %arg0[%c24, %c0_3] : memref<32x64xf32, #tpu.memory_space<vmem>>, vector<8x64xf32>
    %c8 = arith.constant 8 : index
    %c0_4 = arith.constant 0 : index
    %3 = vector.load %arg3[%c8, %c0_4] : memref<16x64xf32, #tpu.memory_space<vmem>>, vector<8x64xf32>
    tpu.vector_store %arg3[%c8, %c0_4], %2 {strides = array<i32>} : memref<16x64xf32, #tpu.memory_space<vmem>>, vector<8x64xf32>,
    %c0_5 = arith.constant 0 : index
    %c0_6 = arith.constant 0 : index
    %4 = vector.load %arg3[%c0_5, %c0_6] : memref<16x64xf32, #tpu.memory_space<vmem>>, vector<16x64xf32>
    %5 = arith.mulf %4, %4 : vector<16x64xf32>
    %cst = arith.constant dense<0.000000e+00> : vector<16xf32>
    %6 = vector.multi_reduction <add>, %5, %cst [1] : vector<16x64xf32> to vector<16xf32>
    %7 = vector.shape_cast %6 : vector<16xf32> to vector<16x1xf32>
    %cst_7 = arith.constant dense<0.000000e+00> : vector<16x16xf32>
    %8 = tpu.matmul %4, %4, %cst_7 {dimension_numbers = #tpu.dot_dimension_numbers<[1], [1], [0], [0], [0, 0, 1, 0], [], []>, precision = #tpu.contract_precision<fp32>} : vector<16x64xf32>, vector<16x64xf32>, vector<16x16xf32> -> vector<16x16xf32>
    %9 = vector.broadcast %7 : vector<16x1xf32> to vector<16x16xf32>
    %10 = arith.subf %9, %8 : vector<16x16xf32>
    %11 = tpu.transpose %10, [1, 0] : vector<16x16xf32> -> vector<16x16xf32>
    %12 = arith.addf %10, %11 : vector<16x16xf32>
    %13 = tpu.iota {dimensions = array<i32: 0>} : vector<16x16xi32>
    %14 = tpu.iota {dimensions = array<i32: 1>} : vector<16x16xi32>
    %15 = arith.cmpi eq, %13, %14 : vector<16x16xi32>
    %cst_8 = arith.constant 0.000000e+00 : f32
    %16 = vector.broadcast %cst_8 : f32 to vector<16x16xf32>
    %17 = arith.select %15, %16, %12 : vector<16x16xi1>, vector<16x16xf32>
    %cst_9 = arith.constant 9.99999996E-13 : f32
    %18 = vector.broadcast %cst_9 : f32 to vector<16x16xf32>
    %19 = arith.maximumf %17, %18 : vector<16x16xf32>
    %20 = math.sqrt %19 : vector<16x16xf32>
    %21 = math.sqrt %20 : vector<16x16xf32>
    %c0_10 = arith.constant 0 : index
    %c0_11 = arith.constant 0 : index
    %22 = vector.load %arg1[%c0_10, %c0_11] : memref<1x16xf32, #tpu.memory_space<vmem>>, vector<1x16xf32>
    %23 = vector.shape_cast %22 : vector<1x16xf32> to vector<1x16xf32>
    %24 = vector.broadcast %23 : vector<1x16xf32> to vector<16x16xf32>
    %25 = tpu.transpose %24, [1, 0] : vector<16x16xf32> -> vector<16x16xf32>
    %26 = arith.cmpf oeq, %24, %25 : vector<16x16xf32>
    %27 = arith.extui %26 : vector<16x16xi1> to vector<16x16xi32>
    %28 = arith.sitofp %27 : vector<16x16xi32> to vector<16x16xf32>
    %cst_12 = arith.constant dense<0.000000e+00> : vector<16xf32>
    %29 = vector.multi_reduction <add>, %28, %cst_12 [1] : vector<16x16xf32> to vector<16xf32>
    %30 = vector.shape_cast %29 : vector<16xf32> to vector<16x1xf32>
    %31 = arith.subf %20, %21 : vector<16x16xf32>
    %32 = arith.mulf %31, %28 : vector<16x16xf32>
    %cst_13 = arith.constant dense<0.000000e+00> : vector<16xf32>
    %33 = vector.multi_reduction <add>, %32, %cst_13 [1] : vector<16x16xf32> to vector<16xf32>
    %34 = vector.shape_cast %33 : vector<16xf32> to vector<16x1xf32>
    %35 = arith.divf %34, %30 : vector<16x1xf32>
    %cst_14 = arith.constant dense<0.000000e+00> : vector<1xf32>
    %36 = vector.multi_reduction <add>, %35, %cst_14 [0] : vector<16x1xf32> to vector<1xf32>
    %37 = vector.shape_cast %36 : vector<1xf32> to vector<1x1xf32>
    %38 = math.absf %37 : vector<1x1xf32>
    %cst_15 = arith.constant 6.250000e-02 : f32
    %39 = vector.broadcast %cst_15 : f32 to vector<1x1xf32>
    %40 = arith.mulf %38, %39 : vector<1x1xf32>
    %c0_16 = arith.constant 0 : index
    %c0_17 = arith.constant 0 : index
    %41 = vector.load %arg2[%c0_16, %c0_17] : memref<1x1xf32, #tpu.memory_space<vmem>>, vector<1x1xf32>
    tpu.vector_store %arg2[%c0_16, %c0_17], %40 {strides = array<i32>} : memref<1x1xf32, #tpu.memory_space<vmem>>, vector<1x1xf32>,
    return
  }
}

</mosaic_0001>

<bundles_post_ra>
// kernel: tri_loss.1
= control target key start
LH: loop header
LB: loop body
LE: loop exit
PB: predicated region body
PF: predicated region fallthrough
CT: control target
= control target key end

     0   :  { %7 = vsyncpa [#allocation4], 0  ;;  %s885_s0 = inlined_call_operand.hbm [shape: f32[32,64], index: 0, kind: input, shape index: {}]   ;;  %s886_s1 = inlined_call_operand.vmem [shape: f32[1,16], index: 1, kind: input, shape index: {}]   ;;  %s887_s2 = inlined_call_operand.hbm [shape: f32[1,1], index: 2, kind: output, shape index: {}]  }
   0x1   :  { %8 = vsyncpa [#allocation5], 0  ;;  %s846_s9 = smov [#allocation3]  }
   0x2   :  { %s14_s10 = sshll.u32 %s846_s9, 4  ;;  %s15_s10 = int_to_ptr.vmem [resolvable:$true] %s14_s10 }
   0x3   :  { %s810_s11 = scalar_lea.vmem %s15_s10, 512  ;;  %p815_p1 = scmp.lt.s32.totalorder %s15_s10, %s15_s10 }
   0x4   :  { %p811_p0 = scmp.ne.s32.totalorder %s15_s10, %s810_s11  ;;  %p816_p2 = scmp.lt.s32.totalorder %s810_s11, %s810_s11 }
   0x6   :  { %p817_p3 = por %p816_p2, %p815_p1 }
   0x8   :  { %p818_p4 = pnand %p817_p3, %p811_p0 }
   0xa   :  { %821 = shalt.err (!%p818_p4)
}
   0xb   :  { %s847_s12 = smov 128   ;;  %s848_s13 = smov 8  }
   0xc   :  { %20 = dma.hbm_to_vmem [thread:$0]  %s885_s0, 512, %s15_s10, [#allocation4], %s847_s12, %s847_s12, %s848_s13  }
   0xd   :  { %842 = dma.done.wait [#allocation4], 512  }
   0xe   :  { %843 = vsyncadd [#allocation4], 4294966784  ;;  %vm27_vm0 = vcmask 523264   ;;  %v26_v0 = vld [vmem:[#allocation3] sm:$0xff]  ;;  %v29_v1 = vld [vmem:[#allocation3 + $0x18] sm:$0xff]  ;;  %v849_v49 = vmov 0.0   ;;  %v585_v54 = vlaneseq }
   0xf   :  { %28 = vst.msk [vmem:[#allocation2] sm:$0xff] %vm27_vm0, %v26_v0  ;;  %30 = vst.msk [vmem:[#allocation2 + $0x8] sm:$0xff] %vm27_vm0, %v29_v1  ;;  %v716_v20 = vld [vmem:[%s886_s1] ss:$0 sm:$0xff]  ;;  %vm669_vm2 = vcmask 130048   ;;  %s850_s1 = smov [#allocation6]  }
  0x10   :  { %v586_v55 = vshrl.u32 %v585_v54, 7  ;;  %v589_v56 = vand.u32 127, %v585_v54  ;;  %s707_s17 = sshll.u32 %s850_s1, 4  ;;  %vm699_vm14 = vcmask 0   ;;  %s708_s17 = int_to_ptr.vmem [resolvable:$true] %s707_s17 }
  0x11   :  { %s822_s18 = scalar_lea.vmem %s708_s17, 16  ;;  %s826_s19 = scalar_lea.vmem %s708_s17, 32 }
  0x12   :  { %vm590_vm4 = vcmp.eq.s32.totalorder %v586_v55, %v589_v56  ;;  %v587_v58 = vadd.s32 8, %v586_v55  ;;  %p823_p5 = scmp.ne.s32.totalorder %s708_s17, %s822_s18  ;;  %p827_p6 = scmp.lt.s32.totalorder %s708_s17, %s708_s17 }
  0x13   :  { %p828_p7 = scmp.lt.s32.totalorder %s826_s19, %s822_s18 }
  0x14   :  { %vm591_vm5 = vcmp.eq.s32.totalorder %v587_v58, %v589_v56 }
  0x15   :  { %p829_p8 = por %p828_p7, %p827_p6 }
  0x16   :  { %v31_v2 = vld [vmem:[#allocation2] sm:$0xff]  ;;  %v32_v3 = vld [vmem:[#allocation2 + $0x8] sm:$0xff] }
  0x17   :  { %v42_v4 = vsel %vm27_vm0, %v31_v2, 0  ;;  %v45_v5 = vsel %vm27_vm0, %v32_v3, 0  ;;  %v33_v6 = vmul.f32 %v31_v2, %v31_v2  ;;  %v34_v9 = vmul.f32 %v32_v3, %v32_v3  ;;  %p830_p9 = pnand %p829_p8, %p823_p5 }
  0x18   :  { %v76_v7 = vand.u32 4294901760, %v45_v5  ;;  %v79_v8 = vand.u32 4294901760, %v42_v4 }
  0x19   :  { %v35_v10 = vsel %vm27_vm0, %v33_v6, 0.0  ;;  %v38_v15 = vsel %vm27_vm0, %v34_v9, 0.0 }
  0x1a   :  { %743 = vmatprep.subr.mxu0 %v76_v7  ;;  %v125_v11 = vsub.f32 %v45_v5, %v76_v7  ;;  %v115_v12 = vsub.f32 %v42_v4, %v79_v8  ;;  %754 = vmatprep.mubr.f32.mxu1 %v79_v8 }
  0x1b   :  { %744 = vmatpush3.xpose.msra.mxu0 %v76_v7  ;;  %36 = vadd.xlane.f32.xlu0 %v35_v10 }
  0x1c   :  { %745 = vmatprep.subr.mxu0 %v79_v8  ;;  %v126_v13 = vand.u32 4294901760, %v125_v11  ;;  %v116_v14 = vand.u32 4294901760, %v115_v12 }
  0x1e   :  { %v127_v16 = vsub.f32 %v125_v11, %v126_v13  ;;  %v117_v17 = vsub.f32 %v115_v12, %v116_v14 }
  0x1f   :  { %746 = vmatpush3.xpose.msra.mxu0 %v79_v8  ;;  %39 = vadd.xlane.f32.xlu0 %v38_v15 }
  0x20   :  { %v128_v18 = vand.u32 4294901760, %v127_v16  ;;  %v118_v19 = vand.u32 4294901760, %v117_v17  ;;  %757 = vmatprep.subr.mxu0 %v125_v11 }
  0x22   :  { %750 = vmatprep.subr.mxu1 %v128_v18  ;;  %747 = vmatprep.mubr.f32.mxu0 %v118_v19 }
  0x23   :  { %751 = vmatpush3.xpose.msra.mxu1 %v128_v18  ;;  %748 = vmatmul.mubr.f32.vlgmr.msra.gmra.mxu0 %v128_v18 }
  0x24   :  { %758 = vmatpush3.xpose.msra.mxu0 %v125_v11  ;;  %752 = vmatprep.subr.mxu1 %v118_v19 }
  0x25   :  { %759 = vmatprep.subr.mxu0 %v115_v12  ;;  %761 = vmatprep.mubr.f32.mxu0 %v115_v12 }
  0x27   :  { %753 = vmatpush3.xpose.msra.mxu1 %v118_v19 }
  0x28   :  { %760 = vmatpush3.xpose.msra.mxu0 %v115_v12  ;;  %764 = vmatprep.subr.mxu1 %v76_v7 }
  0x29   :  { %771 = vmatprep.subr.mxu0 %v126_v13 }
  0x2a   :  { %755 = vmatmul.mubr.f32.vlgmr.msra.gmra.mxu1 %v76_v7 }
  0x2b   :  { %765 = vmatpush3.xpose.msra.mxu1 %v76_v7  ;;  %762 = vmatmul.mubr.f32.vlgmr.msra.gmra.mxu0 %v125_v11 }
  0x2c   :  { %772 = vmatpush3.xpose.msra.mxu0 %v126_v13  ;;  %766 = vmatprep.subr.mxu1 %v79_v8 }
  0x2d   :  { %773 = vmatprep.subr.mxu0 %v116_v14  ;;  %768 = vmatprep.mubr.f32.mxu1 %v116_v14 }
  0x2e   :  { %775 = vmatprep.mubr.f32.mxu0 %v79_v8 }
  0x2f   :  { %767 = vmatpush3.xpose.msra.mxu1 %v79_v8 }
  0x30   :  { %774 = vmatpush3.xpose.msra.mxu0 %v116_v14  ;;  %778 = vmatprep.subr.mxu1 %v76_v7 }
  0x32   :  { %769 = vmatmul.mubr.f32.vlgmr.msra.gmra.mxu1 %v126_v13 }
  0x33   :  { %779 = vmatpush3.xpose.msra.mxu1 %v76_v7  ;;  %776 = vmatmul.mubr.f32.vlgmr.msra.gmra.mxu0 %v76_v7 }
  0x34   :  { %780 = vmatprep.subr.mxu1 %v79_v8  ;;  %782 = vmatprep.mubr.f32.mxu1 %v79_v8 }
  0x37   :  { %781 = vmatpush3.xpose.msra.mxu1 %v79_v8 }
  0x3a   :  { %783 = vmatmul.mubr.f32.vlgmr.msra.gmra.mxu1 %v76_v7 }
  0x4c   :  { %631 = vxpose.xlu0.b32.start [1/2] (short) (narrow) %v716_v20, 16 }
  0x50   :  { %632 = vxpose.xlu0.b32.end [2/2] (short) (narrow) %v716_v20, 16 }
  0xa4   :  { %v37_v37 = vpop.xlane.xlu0 %36 }
  0xa8   :  { %v40_v45 = vpop.xlane.xlu0 %39 }
  0xc8   :  { %v647_v47 = vpop.trf.xlu0 }
  0xc9   :  { %vm663_vm1 = vcmp.eq.f32.partialorder %v716_v20, %v647_v47 }
  0xca   :  { %v717_v50 = vsel %vm663_vm1, 1.0, %v849_v49 }
  0xcb   :  { %v670_v51 = vsel %vm669_vm2, %v717_v50, 0.0 }
  0xcc   :  { %v648_v48 = vpop.trf.xlu0 }
  0xcd   :  { %vm664_vm3 = vcmp.eq.f32.partialorder %v716_v20, %v648_v48 }
  0xce   :  { %v718_v52 = vsel %vm664_vm3, 1.0, %v849_v49 }
  0xcf   :  { %v673_v53 = vsel %vm669_vm2, %v718_v52, 0.0 }
  0xe3   :  { %v749_v21 = vpop.f32.mrf.mxu0 }
  0xe5   :  { %v120_v22 = vpop.f32.mrf.mxu0 }
  0xea   :  { %v756_v23 = vpop.f32.mrf.mxu1 }
  0xeb   :  { %v763_v25 = vpop.f32.mrf.mxu0  ;;  %v218_v29 = vadd.f32 %v756_v23, %v749_v21 }
  0xec   :  { %v211_v24 = vpop.f32.mrf.mxu1 }
  0xed   :  { %v212_v26 = vadd.f32 %v211_v24, %v120_v22  ;;  %v293_v27 = vpop.f32.mrf.mxu0  ;;  %v301_v33 = vadd.f32 %v763_v25, %v218_v29 }
  0xef   :  { %v294_v32 = vadd.f32 %v293_v27, %v212_v26 }
  0xf2   :  { %v770_v28 = vpop.f32.mrf.mxu1 }
  0xf3   :  { %v777_v31 = vpop.f32.mrf.mxu0  ;;  %v384_v36 = vadd.f32 %v770_v28, %v301_v33 }
  0xf4   :  { %v375_v30 = vpop.f32.mrf.mxu1 }
  0xf5   :  { %v376_v34 = vadd.f32 %v375_v30, %v294_v32  ;;  %v460_v35 = vpop.f32.mrf.mxu0  ;;  %v467_v41 = vadd.f32 %v777_v31, %v384_v36 }
  0xf7   :  { %v461_v39 = vadd.f32 %v460_v35, %v376_v34 }
  0xfa   :  { %v784_v38 = vpop.f32.mrf.mxu1 }
  0xfb   :  { %v546_v43 = vadd.f32 %v784_v38, %v467_v41 }
  0xfc   :  { %v539_v40 = vpop.f32.mrf.mxu1 }
  0xfd   :  { %v540_v42 = vadd.f32 %v539_v40, %v461_v39  ;;  %v550_v46 = vsub.f32 %v40_v45, %v546_v43 }
  0xff   :  { %v549_v44 = vsub.f32 %v37_v37, %v540_v42 }
 0x101   :  { %551 = vxpose.xlu1.b32.start [1/2] (short) (narrow) %v549_v44, 16 }
 0x105   :  { %552 = vxpose.xlu1.b32.end [2/2] (short) (narrow) %v550_v46, 16 }
 0x12c   :  { %671 = vadd.xlane.f32.xlu1 %v670_v51 }
 0x130   :  { %674 = vadd.xlane.f32.xlu1 %v673_v53 }
 0x17d   :  { %v567_v57 = vpop.trf.xlu1 }
 0x17e   :  { %v583_v59 = vadd.f32 %v567_v57, %v549_v44 }
 0x180   :  { %v592_v60 = vsel %vm590_vm4, 0.0, %v583_v59 }
 0x181   :  { %v594_v61 = vmax.f32 %v592_v60, 1e-12  ;;  %v568_v62 = vpop.trf.xlu1 }
 0x182   :  { %v584_v63 = vadd.f32 %v568_v62, %v550_v46 }
 0x183   :  { %790 = vrsqrt.f32 %v594_v61  ;;  %vm598_vm6 = vcmp.eq.f32.partialorder %v594_v61, inf  ;;  %v601_v4 = vand.u32 2147483648, %v594_v61  ;;  %vm600_vm7 = vcmp.eq.f32.partialorder %v594_v61, 0.0 }
 0x184   :  { %v593_v0 = vsel %vm591_vm5, 0.0, %v584_v63 }
 0x185   :  { %v595_v1 = vmax.f32 %v593_v0, 1e-12 }
 0x187   :  { %792 = vrsqrt.f32 %v595_v1  ;;  %vm605_vm8 = vcmp.eq.f32.partialorder %v595_v1, inf  ;;  %v608_v9 = vand.u32 2147483648, %v595_v1  ;;  %vm607_vm9 = vcmp.eq.f32.partialorder %v595_v1, 0.0 }
 0x190   :  { %v791_v2 = vpop.eup %790 }
 0x191   :  { %v597_v3 = vmul.f32 %v791_v2, %v594_v61 }
 0x193   :  { %v599_v5 = vsel %vm598_vm6, %v594_v61, %v597_v3 }
 0x194   :  { %v793_v6 = vpop.eup %792  ;;  %v602_v7 = vsel %vm600_vm7, %v601_v4, %v599_v5 }
 0x195   :  { %v604_v8 = vmul.f32 %v793_v6, %v595_v1  ;;  %794 = vrsqrt.f32 %v602_v7  ;;  %vm612_vm10 = vcmp.eq.f32.partialorder %v602_v7, inf  ;;  %v615_v14 = vand.u32 2147483648, %v602_v7 }
 0x196   :  { %vm614_vm11 = vcmp.eq.f32.partialorder %v602_v7, 0.0 }
 0x197   :  { %v606_v10 = vsel %vm605_vm8, %v595_v1, %v604_v8 }
 0x198   :  { %v609_v11 = vsel %vm607_vm9, %v608_v9, %v606_v10 }
 0x199   :  { %796 = vrsqrt.f32 %v609_v11  ;;  %vm619_vm12 = vcmp.eq.f32.partialorder %v609_v11, inf  ;;  %v622_v20 = vand.u32 2147483648, %v609_v11  ;;  %vm621_vm13 = vcmp.eq.f32.partialorder %v609_v11, 0.0 }
 0x1a2   :  { %v795_v12 = vpop.eup %794 }
 0x1a3   :  { %v611_v13 = vmul.f32 %v795_v12, %v602_v7 }
 0x1a5   :  { %v613_v15 = vsel %vm612_vm10, %v602_v7, %v611_v13 }
 0x1a6   :  { %v797_v16 = vpop.eup %796  ;;  %v616_v17 = vsel %vm614_vm11, %v615_v14, %v613_v15 }
 0x1a7   :  { %v676_v18 = vsub.f32 %v602_v7, %v616_v17  ;;  %v618_v19 = vmul.f32 %v797_v16, %v609_v11 }
 0x1a9   :  { %v678_v21 = vmul.f32 %v717_v50, %v676_v18  ;;  %v620_v22 = vsel %vm619_vm12, %v609_v11, %v618_v19 }
 0x1aa   :  { %v623_v23 = vsel %vm621_vm13, %v622_v20, %v620_v22 }
 0x1ab   :  { %v680_v24 = vsel %vm669_vm2, %v678_v21, 0.0  ;;  %v677_v25 = vsub.f32 %v609_v11, %v623_v23 }
 0x1ac   :  { %681 = vadd.xlane.f32.xlu1 %v680_v24 }
 0x1ad   :  { %v679_v26 = vmul.f32 %v718_v52, %v677_v25 }
 0x1af   :  { %v683_v27 = vsel %vm669_vm2, %v679_v26, 0.0 }
 0x1b0   :  { %684 = vadd.xlane.f32.xlu1 %v683_v27 }
 0x1b5   :  { %v672_v28 = vpop.xlane.xlu1 %671 }
 0x1b6   :  { %798 = vrcp.f32 %v672_v28 }
 0x1b9   :  { %v675_v29 = vpop.xlane.xlu1 %674 }
 0x1ba   :  { %800 = vrcp.f32 %v675_v29 }
 0x1c3   :  { %v799_v31 = vpop.eup %798 }
 0x1c7   :  { %v801_v32 = vpop.eup %800 }
 0x235   :  { %v682_v30 = vpop.xlane.xlu1 %681 }
 0x236   :  { %v687_v34 = vmul.f32 %v799_v31, %v682_v30 }
 0x239   :  { %v685_v33 = vpop.xlane.xlu1 %684 }
 0x23a   :  { %v689_v35 = vmul.f32 %v801_v32, %v685_v33 }
 0x23c   :  { %v690_v36 = vadd.f32 %v689_v35, %v687_v34 }
 0x23e   :  { %v691_v37 = vrot.slane %v690_v36, 4 }
 0x240   :  { %v692_v38 = vadd.f32 %v691_v37, %v690_v36 }
 0x242   :  { %v693_v39 = vrot.slane %v692_v38, 2 }
 0x244   :  { %v694_v40 = vadd.f32 %v693_v39, %v692_v38 }
 0x246   :  { %v695_v41 = vrot.slane %v694_v40, 1 }
 0x248   :  { %v696_v42 = vadd.f32 %v695_v41, %v694_v40 }
 0x24a   :  { %v697_v43 = vand.u32 2147483647, %v696_v42 }
 0x24c   :  { %v698_v44 = vmul.f32 0.0625, %v697_v43 }
 0x24e   :  { %700 = vst.msk [vmem:[#allocation6] sm:$0x1] %vm699_vm14, %v698_v44 }
 0x24f   :  { %833 = shalt.err (!%p830_p9)
}
 0x250   :  { %710 = dma.vmem_to_hbm [thread:$0]  %s708_s17, 16, %s887_s2, [#allocation5]  }
 0x251   :  { %844 = dma.done.wait [#allocation5], 16  }
 0x252   :  { %845 = vsyncadd [#allocation5], 4294967280 }
 0x253   :  { %714 = vsyncpa [#allocation4], 1 }
 0x254   :  { %715 = vsyncpa [#allocation5], 1 }

</bundles_post_ra>
